<compile_context>
chip_gen: v7x
topology: tpu7x:2x2x1
jax: 0.10.0
libtpu: 0.0.40
codegen_flags: <defaults>
</compile_context>

<pallas_src>
import functools

import jax
import jax.numpy as jnp
from jax.experimental import pallas as pl
from jax.experimental.pallas import tpu as pltpu


def _residual_kernel(x_ref, halo_ref, w1_ref, w2_ref, o_ref, *,
                     dilation, pad_l, tile_l, tile_b):
    # x_ref:    (Bt, Cin, TL)            central (pre-ReLU) tile, input dtype
    # halo_ref: (Bt, 1, Cin, 2*dilation) [left ctx (pad_l cols) | right ctx (pad_r)]
    # w1_ref:   (3, Cres, Cin)           per-tap conv_1 weights
    # w2_ref:   (Cout, Cres)             1x1 conv_2 weight
    # o_ref:    (Bt, Cout, TL)
    for bi in range(tile_b):                         # small static unroll over batch rows
        xc = x_ref[bi]                               # pre-ReLU tile (used for residual)
        xr = jnp.maximum(xc, 0.0)                    # ReLU #1
        hl = jnp.maximum(halo_ref[bi, 0], 0.0)       # ReLU'd halo (zeros stay zero)

        # Dilated k=3 conv as 3 accumulated MXU dots; taps are lane-shifted views of
        # [left halo | central | right halo] built in registers (no VMEM scratch).
        h = None
        for k in range(3):
            off = k * dilation - pad_l               # static tap offset vs tile start
            if off == 0:
                tap = xr
            elif off < 0:
                tap = jnp.concatenate(
                    [hl[:, pad_l + off:pad_l], xr[:, :tile_l + off]], axis=1)
            else:
                tap = jnp.concatenate(
                    [xr[:, off:], hl[:, pad_l:pad_l + off]], axis=1)
            hk = jnp.dot(w1_ref[k], tap, preferred_element_type=jnp.float32)
            h = hk if h is None else h + hk

        h = jnp.maximum(h, 0.0).astype(w2_ref.dtype)                    # ReLU #2
        y = jnp.dot(w2_ref[...], h, preferred_element_type=jnp.float32)  # 1x1 conv
        o_ref[bi] = (xc.astype(jnp.float32) + y).astype(o_ref.dtype)     # residual add


def _round_up(v, m):
    return (v + m - 1) // m * m


def _choose_tiles(batch, length, c_in, c_res, c_out, itemsize, halo_w):
    """length is a multiple of 128.  Pick (tile_l, tile_b): biggest lane-dense L tile
    whose pipelined working set fits a v7x-safe VMEM budget, then block batch rows
    while per-step DMA bytes are still small (short-L / few-tile path)."""
    budget = 24 * 1024 * 1024                       # well under v7x's 64 MiB physical
    weight_bytes = 4 * (3 * c_res * c_in + c_out * c_res)

    def footprint(bt, tl):
        io = 2 * bt * itemsize * (c_in * (tl + halo_w) + c_out * tl)  # 2x-buffered in/out
        interm = 4 * bt * tl * (2 * c_in + c_res + c_out)             # f32 taps / h / y
        return io + interm + weight_bytes

    tile_l = 128
    for tl in range(128, min(length, 8192) + 1, 128):
        if length % tl == 0 and footprint(1, tl) <= budget:
            tile_l = tl

    tile_b = 1
    per_step_target = 2 * 1024 * 1024
    for bt in range(2, batch + 1):
        if batch % bt != 0:
            continue
        if footprint(bt, tile_l) > budget:
            break
        if tile_b * itemsize * tile_l * (c_in + c_out) >= per_step_target:
            break
        tile_b = bt
    return tile_l, tile_b


def residual_forward(x_ncl, w1_ock, w2_oc, *, dilation=1, pad_right_only=False,
                     tile_l=None, tile_b=None):
    """x_ncl:  (B, C_in, L)  PyTorch NCL layout (kept end-to-end, no transposes).
    w1_ock: (C_res, C_in, 3) conv_1 weight (PyTorch layout, bias=False)
    w2_oc:  (C_out, C_res)   conv_2 (kernel=1) weight, bias=False
    Returns (B, C_out, L).  Requires C_out == C_in for the residual add.
    """
    B, C_in, L = x_ncl.shape
    C_res, C_in_w, K = w1_ock.shape
    C_out = w2_oc.shape[0]
    assert K == 3 and C_in_w == C_in and C_out == C_in and dilation >= 1
    assert w2_oc.shape == (C_out, C_res)

    total_pad = dilation * (K - 1)
    pad_l = 0 if pad_right_only else total_pad // 2
    pad_r = total_pad - pad_l

    # Lane-dense length: pad L up to a multiple of 128 (the zero tail is identical to
    # the conv's "same" zero padding; extra output columns are sliced off below).
    L_run = L if L % 128 == 0 else _round_up(L, 128)
    x_run = x_ncl if L_run == L else jnp.pad(x_ncl, ((0, 0), (0, 0), (0, L_run - L)))

    itemsize = jnp.dtype(x_ncl.dtype).itemsize
    auto_tl, auto_tb = _choose_tiles(B, L_run, C_in, C_res, C_out, itemsize, total_pad)
    tile_l = auto_tl if tile_l is None else tile_l
    tile_b = auto_tb if tile_b is None else tile_b
    assert L_run % tile_l == 0 and B % tile_b == 0 and total_pad < tile_l
    n_l = L_run // tile_l

    # Tiny halo sidecar: for each L tile, the pad_l columns just before it and the
    # pad_r columns just after it (zeros outside the sequence).  Only ~2*dilation/TL
    # of the input, so the main activation stream incurs no duplicate HBM pass.
    def _zero_cols(w):
        return jnp.zeros((B, C_in, w), x_run.dtype)

    tiles = []
    for l in range(n_l):
        parts = []
        if pad_l > 0:
            parts.append(_zero_cols(pad_l) if l == 0 else
                         jax.lax.slice_in_dim(x_run, l * tile_l - pad_l, l * tile_l,
                                              axis=2))
        start = (l + 1) * tile_l
        avail = max(0, min(pad_r, L_run - start))
        if avail > 0:
            parts.append(jax.lax.slice_in_dim(x_run, start, start + avail, axis=2))
        if pad_r - avail > 0:
            parts.append(_zero_cols(pad_r - avail))
        tiles.append(jnp.concatenate(parts, axis=2) if len(parts) > 1 else parts[0])
    halo = jnp.stack(tiles, axis=1)                       # (B, n_l, C_in, 2*dilation)

    # Per-tap (Cres, Cin) weight slabs; keep the activation dtype for MXU operands.
    w1_k = jnp.transpose(w1_ock, (2, 0, 1)).astype(x_run.dtype)   # (3, C_res, C_in)
    w2 = w2_oc.astype(x_run.dtype)

    kernel = functools.partial(_residual_kernel, dilation=dilation, pad_l=pad_l,
                               tile_l=tile_l, tile_b=tile_b)

    out = pl.pallas_call(
        kernel,
        out_shape=jax.ShapeDtypeStruct((B, C_out, L_run), x_ncl.dtype),
        grid=(B // tile_b, n_l),
        in_specs=[
            pl.BlockSpec((tile_b, C_in, tile_l), lambda b, l: (b, 0, l)),
            pl.BlockSpec((tile_b, 1, C_in, total_pad), lambda b, l: (b, l, 0, 0)),
            pl.BlockSpec((3, C_res, C_in), lambda b, l: (0, 0, 0)),    # resident
            pl.BlockSpec((C_out, C_res), lambda b, l: (0, 0)),         # resident
        ],
        out_specs=pl.BlockSpec((tile_b, C_out, tile_l), lambda b, l: (b, 0, l)),
        compiler_params=pltpu.CompilerParams(
            dimension_semantics=("parallel", "parallel"),   # independent tiles -> megacore
            vmem_limit_bytes=40 * 1024 * 1024,              # safe under v7x's 64 MiB
        ),
    )(x_run, halo, w1_k, w2)

    return out if L_run == L else out[:, :, :L]


def _reference(x_ncl, w1_ock, w2_oc, *, dilation, pad_right_only):
    # pure-JAX reference (same math, no Pallas) for a sanity check
    B, C_in, L = x_ncl.shape
    K = w1_ock.shape[-1]
    total = dilation * (K - 1)
    pad_l = 0 if pad_right_only else total // 2
    pad_r = total - pad_l
    xr = jnp.maximum(x_ncl, 0.0)
    xp = jnp.pad(xr, ((0, 0), (0, 0), (pad_l, pad_r)))
    h = sum(jnp.einsum("rc,bct->brt", w1_ock[:, :, k],
                       xp[:, :, k * dilation:k * dilation + L]) for k in range(K))
    y = jnp.einsum("or,brt->bot", w2_oc, jnp.maximum(h, 0.0))
    return x_ncl + y


if __name__ == "__main__":
    key = jax.random.PRNGKey(0)

    def run_case(B, in_channels, num_residual_hiddens, L, dilation, pad_right_only,
                 tile_l=None, tile_b=None):
        num_hiddens = in_channels          # residual add requires matching channels
        kx, k1, k2 = jax.random.split(jax.random.fold_in(key, L + 7 * dilation), 3)
        x = jax.random.normal(kx, (B, in_channels, L), dtype=jnp.float32)
        # deterministic kaiming-normal-style init (fan_in scaling), bias=False
        fan1 = in_channels * 3
        w1 = jax.random.normal(k1, (num_residual_hiddens, in_channels, 3),
                               dtype=jnp.float32) * jnp.sqrt(2.0 / fan1)
        fan2 = num_residual_hiddens
        w2 = jax.random.normal(k2, (num_hiddens, num_residual_hiddens),
                               dtype=jnp.float32) * jnp.sqrt(2.0 / fan2)
        # TODO(synk): nn.utils.weight_norm is an identity reparam at forward time for
        # a given weight value, so it is not modeled separately here.
        out = residual_forward(x, w1, w2, dilation=dilation,
                               pad_right_only=pad_right_only, tile_l=tile_l,
                               tile_b=tile_b)
        out = jax.block_until_ready(out)
        ref = _reference(x, w1, w2, dilation=dilation, pad_right_only=pad_right_only)
        assert out.shape == (B, num_hiddens, L)
        assert jnp.allclose(out, ref, atol=1e-5, rtol=1e-5), (
            "max abs err " + str(float(jnp.max(jnp.abs(out - ref)))))

    # module-scale shape: ragged L=16 -> padded to one lane-dense tile, batch-blocked
    run_case(B=2, in_channels=32, num_residual_hiddens=16, L=16,
             dilation=2, pad_right_only=False)
    # L-tiled path: 2 tiles of 128, right-only padding, real halo crossing the tile edge
    run_case(B=2, in_channels=32, num_residual_hiddens=16, L=256,
             dilation=1, pad_right_only=True, tile_l=128, tile_b=1)
    # centered padding with larger dilation, auto tiles (single 256-wide tile, Bt=2)
    run_case(B=2, in_channels=32, num_residual_hiddens=16, L=256,
             dilation=3, pad_right_only=False)

    print("KERNEL_OK")
</pallas_src>

<mosaic_0001>
module attributes {stable_mosaic.version = 11 : i64} {
  func.func @_residual_kernel(%arg0: i32, %arg1: i32, %arg2: memref<2x32x128xf32, #tpu.memory_space<vmem>>, %arg3: memref<2x1x32x4xf32, #tpu.memory_space<vmem>>, %arg4: memref<3x16x32xf32, #tpu.memory_space<vmem>>, %arg5: memref<32x16xf32, #tpu.memory_space<vmem>>, %arg6: memref<2x32x128xf32, #tpu.memory_space<vmem>>) attributes {dimension_semantics = [#tpu.dimension_semantics<parallel>, #tpu.dimension_semantics<parallel>], iteration_bounds = array<i64: 1, 1>, scalar_prefetch = 0 : i64, scratch_operands = 0 : i64, tpu.core_type = #tpu.core_type<tc>, window_params = [{transform_indices = @transform_0, window_bounds = array<i64: 2, 32, 128>}, {transform_indices = @transform_1, window_bounds = array<i64: 2, 1, 32, 4>}, {pipeline_mode = #tpu.pipeline_mode<synchronous>, transform_indices = @transform_2, window_bounds = array<i64: 3, 16, 32>}, {pipeline_mode = #tpu.pipeline_mode<synchronous>, transform_indices = @transform_3, window_bounds = array<i64: 32, 16>}, {transform_indices = @transform_4, window_bounds = array<i64: 2, 32, 128>}]} {
    %c0 = arith.constant 0 : index
    %c0_0 = arith.constant 0 : index
    %c0_1 = arith.constant 0 : index
    %0 = vector.load %arg2[%c0, %c0_0, %c0_1] : memref<2x32x128xf32, #tpu.memory_space<vmem>>, vector<1x32x128xf32>
    %1 = vector.shape_cast %0 : vector<1x32x128xf32> to vector<32x128xf32>
    %cst = arith.constant 0.000000e+00 : f32
    %2 = vector.broadcast %cst : f32 to vector<32x128xf32>
    %3 = arith.maximumf %1, %2 : vector<32x128xf32>
    %c0_2 = arith.constant 0 : index
    %c0_3 = arith.constant 0 : index
    %c0_4 = arith.constant 0 : index
    %c0_5 = arith.constant 0 : index
    %4 = vector.load %arg3[%c0_2, %c0_3, %c0_4, %c0_5] : memref<2x1x32x4xf32, #tpu.memory_space<vmem>>, vector<1x1x32x4xf32>
    %5 = vector.shape_cast %4 : vector<1x1x32x4xf32> to vector<32x4xf32>
    %cst_6 = arith.constant 0.000000e+00 : f32
    %6 = vector.broadcast %cst_6 : f32 to vector<32x4xf32>
    %7 = arith.maximumf %5, %6 : vector<32x4xf32>
    %8 = vector.extract_strided_slice %7 {offsets = [0, 0], sizes = [32, 2], strides = [1, 1]} : vector<32x4xf32> to vector<32x2xf32>
    %9 = vector.extract_strided_slice %3 {offsets = [0, 0], sizes = [32, 126], strides = [1, 1]} : vector<32x128xf32> to vector<32x126xf32>
    %10 = tpu.concatenate %8, %9 in 1 : vector<32x2xf32>, vector<32x126xf32> -> vector<32x128xf32>
    %c0_7 = arith.constant 0 : index
    %c0_8 = arith.constant 0 : index
    %c0_9 = arith.constant 0 : index
    %11 = vector.load %arg4[%c0_7, %c0_8, %c0_9] : memref<3x16x32xf32, #tpu.memory_space<vmem>>, vector<1x16x32xf32>
    %12 = vector.shape_cast %11 : vector<1x16x32xf32> to vector<16x32xf32>
    %cst_10 = arith.constant dense<0.000000e+00> : vector<16x128xf32>
    %13 = tpu.matmul %12, %10, %cst_10 {dimension_numbers = #tpu.dot_dimension_numbers<[1], [0], [0], [1], [0, 0, 1, 1], [], []>} : vector<16x32xf32>, vector<32x128xf32>, vector<16x128xf32> -> vector<16x128xf32>
    %c1 = arith.constant 1 : index
    %c0_11 = arith.constant 0 : index
    %c0_12 = arith.constant 0 : index
    %14 = vector.load %arg4[%c1, %c0_11, %c0_12] : memref<3x16x32xf32, #tpu.memory_space<vmem>>, vector<1x16x32xf32>
    %15 = vector.shape_cast %14 : vector<1x16x32xf32> to vector<16x32xf32>
    %cst_13 = arith.constant dense<0.000000e+00> : vector<16x128xf32>
    %16 = tpu.matmul %15, %3, %cst_13 {dimension_numbers = #tpu.dot_dimension_numbers<[1], [0], [0], [1], [0, 0, 1, 1], [], []>} : vector<16x32xf32>, vector<32x128xf32>, vector<16x128xf32> -> vector<16x128xf32>
    %17 = arith.addf %13, %16 : vector<16x128xf32>
    %18 = vector.extract_strided_slice %3 {offsets = [0, 2], sizes = [32, 126], strides = [1, 1]} : vector<32x128xf32> to vector<32x126xf32>
    %19 = vector.extract_strided_slice %7 {offsets = [0, 2], sizes = [32, 2], strides = [1, 1]} : vector<32x4xf32> to vector<32x2xf32>
    %20 = tpu.concatenate %18, %19 in 1 : vector<32x126xf32>, vector<32x2xf32> -> vector<32x128xf32>
    %c2 = arith.constant 2 : index
    %c0_14 = arith.constant 0 : index
    %c0_15 = arith.constant 0 : index
    %21 = vector.load %arg4[%c2, %c0_14, %c0_15] : memref<3x16x32xf32, #tpu.memory_space<vmem>>, vector<1x16x32xf32>
    %22 = vector.shape_cast %21 : vector<1x16x32xf32> to vector<16x32xf32>
    %cst_16 = arith.constant dense<0.000000e+00> : vector<16x128xf32>
    %23 = tpu.matmul %22, %20, %cst_16 {dimension_numbers = #tpu.dot_dimension_numbers<[1], [0], [0], [1], [0, 0, 1, 1], [], []>} : vector<16x32xf32>, vector<32x128xf32>, vector<16x128xf32> -> vector<16x128xf32>
    %24 = arith.addf %17, %23 : vector<16x128xf32>
    %cst_17 = arith.constant 0.000000e+00 : f32
    %25 = vector.broadcast %cst_17 : f32 to vector<16x128xf32>
    %26 = arith.maximumf %24, %25 : vector<16x128xf32>
    %c0_18 = arith.constant 0 : index
    %c0_19 = arith.constant 0 : index
    %27 = vector.load %arg5[%c0_18, %c0_19] : memref<32x16xf32, #tpu.memory_space<vmem>>, vector<32x16xf32>
    %cst_20 = arith.constant dense<0.000000e+00> : vector<32x128xf32>
    %28 = tpu.matmul %27, %26, %cst_20 {dimension_numbers = #tpu.dot_dimension_numbers<[1], [0], [0], [1], [0, 0, 1, 1], [], []>} : vector<32x16xf32>, vector<16x128xf32>, vector<32x128xf32> -> vector<32x128xf32>
    %29 = arith.addf %1, %28 : vector<32x128xf32>
    %c0_21 = arith.constant 0 : index
    %c0_22 = arith.constant 0 : index
    %c0_23 = arith.constant 0 : index
    %30 = vector.load %arg6[%c0_21, %c0_22, %c0_23] : memref<2x32x128xf32, #tpu.memory_space<vmem>>, vector<1x32x128xf32>
    %31 = vector.shape_cast %30 : vector<1x32x128xf32> to vector<32x128xf32>
    %32 = vector.shape_cast %29 : vector<32x128xf32> to vector<1x32x128xf32>
    tpu.vector_store %arg6[%c0_21, %c0_22, %c0_23], %32 {strides = array<i32>} : memref<2x32x128xf32, #tpu.memory_space<vmem>>, vector<1x32x128xf32>,
    %c1_24 = arith.constant 1 : index
    %c0_25 = arith.constant 0 : index
    %c0_26 = arith.constant 0 : index
    %33 = vector.load %arg2[%c1_24, %c0_25, %c0_26] : memref<2x32x128xf32, #tpu.memory_space<vmem>>, vector<1x32x128xf32>
    %34 = vector.shape_cast %33 : vector<1x32x128xf32> to vector<32x128xf32>
    %cst_27 = arith.constant 0.000000e+00 : f32
    %35 = vector.broadcast %cst_27 : f32 to vector<32x128xf32>
    %36 = arith.maximumf %34, %35 : vector<32x128xf32>
    %c1_28 = arith.constant 1 : index
    %c0_29 = arith.constant 0 : index
    %c0_30 = arith.constant 0 : index
    %c0_31 = arith.constant 0 : index
    %37 = vector.load %arg3[%c1_28, %c0_29, %c0_30, %c0_31] : memref<2x1x32x4xf32, #tpu.memory_space<vmem>>, vector<1x1x32x4xf32>
    %38 = vector.shape_cast %37 : vector<1x1x32x4xf32> to vector<32x4xf32>
    %cst_32 = arith.constant 0.000000e+00 : f32
    %39 = vector.broadcast %cst_32 : f32 to vector<32x4xf32>
    %40 = arith.maximumf %38, %39 : vector<32x4xf32>
    %41 = vector.extract_strided_slice %40 {offsets = [0, 0], sizes = [32, 2], strides = [1, 1]} : vector<32x4xf32> to vector<32x2xf32>
    %42 = vector.extract_strided_slice %36 {offsets = [0, 0], sizes = [32, 126], strides = [1, 1]} : vector<32x128xf32> to vector<32x126xf32>
    %43 = tpu.concatenate %41, %42 in 1 : vector<32x2xf32>, vector<32x126xf32> -> vector<32x128xf32>
    %c0_33 = arith.constant 0 : index
    %c0_34 = arith.constant 0 : index
    %c0_35 = arith.constant 0 : index
    %44 = vector.load %arg4[%c0_33, %c0_34, %c0_35] : memref<3x16x32xf32, #tpu.memory_space<vmem>>, vector<1x16x32xf32>
    %45 = vector.shape_cast %44 : vector<1x16x32xf32> to vector<16x32xf32>
    %cst_36 = arith.constant dense<0.000000e+00> : vector<16x128xf32>
    %46 = tpu.matmul %45, %43, %cst_36 {dimension_numbers = #tpu.dot_dimension_numbers<[1], [0], [0], [1], [0, 0, 1, 1], [], []>} : vector<16x32xf32>, vector<32x128xf32>, vector<16x128xf32> -> vector<16x128xf32>
    %c1_37 = arith.constant 1 : index
    %c0_38 = arith.constant 0 : index
    %c0_39 = arith.constant 0 : index
    %47 = vector.load %arg4[%c1_37, %c0_38, %c0_39] : memref<3x16x32xf32, #tpu.memory_space<vmem>>, vector<1x16x32xf32>
    %48 = vector.shape_cast %47 : vector<1x16x32xf32> to vector<16x32xf32>
    %cst_40 = arith.constant dense<0.000000e+00> : vector<16x128xf32>
    %49 = tpu.matmul %48, %36, %cst_40 {dimension_numbers = #tpu.dot_dimension_numbers<[1], [0], [0], [1], [0, 0, 1, 1], [], []>} : vector<16x32xf32>, vector<32x128xf32>, vector<16x128xf32> -> vector<16x128xf32>
    %50 = arith.addf %46, %49 : vector<16x128xf32>
    %51 = vector.extract_strided_slice %36 {offsets = [0, 2], sizes = [32, 126], strides = [1, 1]} : vector<32x128xf32> to vector<32x126xf32>
    %52 = vector.extract_strided_slice %40 {offsets = [0, 2], sizes = [32, 2], strides = [1, 1]} : vector<32x4xf32> to vector<32x2xf32>
    %53 = tpu.concatenate %51, %52 in 1 : vector<32x126xf32>, vector<32x2xf32> -> vector<32x128xf32>
    %c2_41 = arith.constant 2 : index
    %c0_42 = arith.constant 0 : index
    %c0_43 = arith.constant 0 : index
    %54 = vector.load %arg4[%c2_41, %c0_42, %c0_43] : memref<3x16x32xf32, #tpu.memory_space<vmem>>, vector<1x16x32xf32>
    %55 = vector.shape_cast %54 : vector<1x16x32xf32> to vector<16x32xf32>
    %cst_44 = arith.constant dense<0.000000e+00> : vector<16x128xf32>
    %56 = tpu.matmul %55, %53, %cst_44 {dimension_numbers = #tpu.dot_dimension_numbers<[1], [0], [0], [1], [0, 0, 1, 1], [], []>} : vector<16x32xf32>, vector<32x128xf32>, vector<16x128xf32> -> vector<16x128xf32>
    %57 = arith.addf %50, %56 : vector<16x128xf32>
    %cst_45 = arith.constant 0.000000e+00 : f32
    %58 = vector.broadcast %cst_45 : f32 to vector<16x128xf32>
    %59 = arith.maximumf %57, %58 : vector<16x128xf32>
    %c0_46 = arith.constant 0 : index
    %c0_47 = arith.constant 0 : index
    %60 = vector.load %arg5[%c0_46, %c0_47] : memref<32x16xf32, #tpu.memory_space<vmem>>, vector<32x16xf32>
    %cst_48 = arith.constant dense<0.000000e+00> : vector<32x128xf32>
    %61 = tpu.matmul %60, %59, %cst_48 {dimension_numbers = #tpu.dot_dimension_numbers<[1], [0], [0], [1], [0, 0, 1, 1], [], []>} : vector<32x16xf32>, vector<16x128xf32>, vector<32x128xf32> -> vector<32x128xf32>
    %62 = arith.addf %34, %61 : vector<32x128xf32>
    %c1_49 = arith.constant 1 : index
    %c0_50 = arith.constant 0 : index
    %c0_51 = arith.constant 0 : index
    %63 = vector.load %arg6[%c1_49, %c0_50, %c0_51] : memref<2x32x128xf32, #tpu.memory_space<vmem>>, vector<1x32x128xf32>
    %64 = vector.shape_cast %63 : vector<1x32x128xf32> to vector<32x128xf32>
    %65 = vector.shape_cast %62 : vector<32x128xf32> to vector<1x32x128xf32>
    tpu.vector_store %arg6[%c1_49, %c0_50, %c0_51], %65 {strides = array<i32>} : memref<2x32x128xf32, #tpu.memory_space<vmem>>, vector<1x32x128xf32>,
    return
  }
  func.func @transform_0(%arg0: i32, %arg1: i32) -> (i32, i32, i32) {
    %c0_i32 = arith.constant 0 : i32
    %c0_i32_0 = arith.constant 0 : i32
    return %arg0, %c0_i32, %arg1 : i32, i32, i32
  }
  func.func @transform_1(%arg0: i32, %arg1: i32) -> (i32, i32, i32, i32) {
    %c0_i32 = arith.constant 0 : i32
    %c0_i32_0 = arith.constant 0 : i32
    %c0_i32_1 = arith.constant 0 : i32
    return %arg0, %arg1, %c0_i32, %c0_i32_0 : i32, i32, i32, i32
  }
  func.func @transform_2(%arg0: i32, %arg1: i32) -> (i32, i32, i32) {
    %c0_i32 = arith.constant 0 : i32
    %c0_i32_0 = arith.constant 0 : i32
    %c0_i32_1 = arith.constant 0 : i32
    %c0_i32_2 = arith.constant 0 : i32
    return %c0_i32, %c0_i32_0, %c0_i32_1 : i32, i32, i32
  }
  func.func @transform_3(%arg0: i32, %arg1: i32) -> (i32, i32) {
    %c0_i32 = arith.constant 0 : i32
    %c0_i32_0 = arith.constant 0 : i32
    %c0_i32_1 = arith.constant 0 : i32
    return %c0_i32, %c0_i32_0 : i32, i32
  }
  func.func @transform_4(%arg0: i32, %arg1: i32) -> (i32, i32, i32) {
    %c0_i32 = arith.constant 0 : i32
    %c0_i32_0 = arith.constant 0 : i32
    return %arg0, %c0_i32, %arg1 : i32, i32, i32
  }
}

</mosaic_0001>

<bundles_post_ra>
// kernel: tpu_custom_call.1
= control target key start
LH: loop header
LB: loop body
LE: loop exit
PB: predicated region body
PF: predicated region fallthrough
CT: control target
= control target key end

     0   :  { %vm60_vm0 = vcmask 261120   ;;  %s1532_s0 = inlined_call_operand.vmem [shape: f32[2,32,128], index: 0, kind: input, shape index: {}]   ;;  %s1533_s1 = inlined_call_operand.vmem [shape: f32[2,1,32,4], index: 1, kind: input, shape index: {}]   ;;  %s1534_s2 = inlined_call_operand.vmem [shape: f32[3,16,32], index: 2, kind: input, shape index: {}]   ;;  %s1535_s3 = inlined_call_operand.vmem [shape: f32[32,16], index: 3, kind: input, shape index: {}]   ;;  %s1536_s4 = inlined_call_operand.hbm [shape: f32[2,32,128], index: 4, kind: output, shape index: {}]  }
   0x1   :  { %v1261_v0 = vld [vmem:[%s1532_s0] sm:$0xff]  ;;  %v1266_v1 = vld [vmem:[%s1532_s0 + $0x8] sm:$0xff]  ;;  %v1284_v7 = vld [vmem:[%s1532_s0 + $0x10] sm:$0xff] }
   0x2   :  { %v1271_v2 = vld [vmem:[%s1533_s1] sm:$0xff]  ;;  %v22_v3 = vmax.f32 %v1261_v0, 0.0  ;;  %v23_v4 = vmax.f32 %v1266_v1, 0.0  ;;  %v1278_v5 = vld [vmem:[%s1533_s1 + $0x8] sm:$0xff]  ;;  %v1290_v9 = vld [vmem:[%s1532_s0 + $0x18] sm:$0xff]  ;;  %v24_v10 = vmax.f32 %v1284_v7, 0.0 }
   0x3   :  { %v30_v6 = vmax.f32 %v1271_v2, 0.0  ;;  %v31_v8 = vmax.f32 %v1278_v5, 0.0  ;;  %v1296_v11 = vld [vmem:[%s1533_s1 + $0x10] sm:$0xff]  ;;  %v1301_v12 = vld [vmem:[%s1533_s1 + $0x18] sm:$0xff]  ;;  %v25_v14 = vmax.f32 %v1290_v9, 0.0 }
   0x4   :  { %v1153_v13 = vpack.i.bf16 %v23_v4, %v22_v3  ;;  %v1307_v15 = vld [vmem:[%s1534_s2 + $0x10] sm:$0xff]  ;;  %v32_v16 = vmax.f32 %v1296_v11, 0.0  ;;  %v1073_v17 = vpack.c.bf16 %v23_v4, %v22_v3 }
   0x5   :  { %995 = vmatprep.mubr.msk.f32.mxu0 %vm60_vm0, %v1307_v15 }
   0x6   :  { %9 = vsyncpa [#allocation3], 0  ;;  %s1227_s7 = smov 126   ;;  %s1228_s8 = smov 2   ;;  %v1158_v18 = vpack.i.bf16 %v31_v8, %v30_v6  ;;  %v1148_v19 = vpack.i.bf16 %v25_v14, %v24_v10  ;;  %v33_v20 = vmax.f32 %v1301_v12, 0.0  ;;  %v1077_v21 = vpack.c.bf16 %v25_v14, %v24_v10  ;;  %1074 = vmatprep.subr.bf16.mxu0 %v1073_v17  ;;  %v1328_v23 = vld [vmem:[%s1534_s2 + $0x18] sm:$0xff] }
   0x7   :  { %1154 = vrot.lane.b32.xlu1 %v1153_v13, %s1227_s7  ;;  %1144 = vrot.lane.b32.xlu0 %v1153_v13, %s1228_s8  ;;  %s1229_s9 = smov 124   ;;  %v1333_v24 = vld [vmem:[%s1534_s2] sm:$0xff]  ;;  %v1345_v26 = vld [vmem:[%s1532_s0 + $0x28] sm:$0xff]  ;;  %vm50_vm1 = vcmask 15360   ;;  %vm251_vm2 = vcmask 1031168   ;;  %vm348_vm3 = vcmask 130048  }
   0x8   :  { %1076 = vmatpush3.bf16.msra.mxu0 %v1073_v17  ;;  %v1168_v22 = vpack.i.bf16 %v33_v20, %v32_v16  ;;  %v1340_v25 = vld [vmem:[%s1532_s0 + $0x20] sm:$0xff]  ;;  %v460_v28 = vmax.f32 %v1345_v26, 0.0  ;;  %v1354_v29 = vld [vmem:[%s1532_s0 + $0x30] sm:$0xff]  ;;  %v1359_v30 = vld [vmem:[%s1532_s0 + $0x38] sm:$0xff] }
   0x9   :  { %1078 = vmatprep.subr.bf16.mxu0 %v1077_v21  ;;  %v459_v27 = vmax.f32 %v1340_v25, 0.0  ;;  %v1364_v31 = vld [vmem:[%s1533_s1 + $0x20] sm:$0xff]  ;;  %v461_v32 = vmax.f32 %v1354_v29, 0.0  ;;  %v462_v33 = vmax.f32 %v1359_v30, 0.0  ;;  %v1373_v34 = vld [vmem:[%s1533_s1 + $0x28] sm:$0xff]  ;;  %v1384_v38 = vld [vmem:[%s1533_s1 + $0x30] sm:$0xff] }
   0xa   :  { %v468_v35 = vmax.f32 %v1364_v31, 0.0  ;;  %v469_v37 = vmax.f32 %v1373_v34, 0.0  ;;  %v1389_v39 = vld [vmem:[%s1533_s1 + $0x38] sm:$0xff]  ;;  %v470_v42 = vmax.f32 %v1384_v38, 0.0  ;;  %v1428_v11 = vld [vmem:[%s1534_s2 + $0x8] sm:$0xff]  ;;  %v1435_v17 = vld [vmem:[%s1534_s2 + $0x20] sm:$0xff] }
   0xb   :  { %1159 = vrot.lane.b32.xlu1 %v1158_v18, %s1229_s9  ;;  %1149 = vrot.lane.b32.xlu0 %v1148_v19, %s1228_s8  ;;  %v1173_v36 = vpack.i.bf16 %v460_v28, %v459_v27  ;;  %v1178_v40 = vpack.i.bf16 %v462_v33, %v461_v32  ;;  %v471_v43 = vmax.f32 %v1389_v39, 0.0  ;;  %v1444_v18 = vld [vmem:[%s1534_s2 + $0x28] sm:$0xff]  ;;  %v347_v31 = vld [vmem:[%s1535_s3 + $0x18] sm:$0xff] }
   0xc   :  { %1080 = vmatpush3.bf16.msra.mxu0 %v1077_v21  ;;  %v1188_v41 = vpack.i.bf16 %v469_v37, %v468_v35 }
   0xd   :  { %v1198_v44 = vpack.i.bf16 %v471_v43, %v470_v42 }
   0xf   :  { %1169 = vrot.lane.b32.xlu1 %v1168_v22, %s1229_s9  ;;  %1164 = vrot.lane.b32.xlu0 %v1148_v19, %s1227_s7  ;;  %v344_v19 = vld [vmem:[%s1535_s3] sm:$0xff] }
  0x10   :  { %996 = vmatmul.mubr.msk.f32.vlgmr.msra.gmra.mrb[0].mxu0 %vm60_vm0, %v1328_v23  ;;  %1024 = vmatprep.mubr.msk.f32.mxu1 %vm348_vm3, %v344_v19 }
  0x11   :  { %1006 = vmatprep.mubr.msk.f32.mxu0 %vm60_vm0, %v1333_v24 }
  0x13   :  { %1174 = vrot.lane.b32.xlu0 %v1173_v36, %s1228_s8  ;;  %1179 = vrot.lane.b32.xlu1 %v1178_v40, %s1228_s8 }
  0x17   :  { %1184 = vrot.lane.b32.xlu0 %v1173_v36, %s1227_s7  ;;  %1189 = vrot.lane.b32.xlu1 %v1188_v41, %s1229_s9 }
  0x1b   :  { %1194 = vrot.lane.b32.xlu0 %v1178_v40, %s1227_s7  ;;  %1199 = vrot.lane.b32.xlu1 %v1198_v44, %s1229_s9 }
  0x79   :  { %v1155_v45 = vpop.permute.xlu1 %1154  ;;  %v1145_v46 = vpop.permute.xlu0 %1144 }
  0x7a   :  { %v1147_v47 = vunpack.i.h.bf16 %v1145_v46  ;;  %v1146_v48 = vunpack.i.l.bf16 %v1145_v46  ;;  %v1157_v49 = vunpack.i.h.bf16 %v1155_v45  ;;  %v1156_v50 = vunpack.i.l.bf16 %v1155_v45 }
  0x7b   :  { %v1101_v45 = vpack.c.bf16 %v460_v28, %v459_v27  ;;  %v1105_v27 = vpack.c.bf16 %v462_v33, %v461_v32 }
  0x7c   :  { %v51_v51 = vsel %vm50_vm1, %v30_v6, %v1146_v48  ;;  %v52_v52 = vsel %vm50_vm1, %v31_v8, %v1147_v47  ;;  %v1460_v48 = vld [vmem:[%s1535_s3 + $0x8] sm:$0xff] }
  0x7d   :  { %v1160_v53 = vpop.permute.xlu1 %1159  ;;  %v1150_v54 = vpop.permute.xlu0 %1149  ;;  %v1081_v55 = vpack.c.bf16 %v52_v52, %v51_v51 }
  0x7e   :  { %v1162_v56 = vunpack.i.h.bf16 %v1160_v53  ;;  %v1161_v57 = vunpack.i.l.bf16 %v1160_v53  ;;  %v1152_v58 = vunpack.i.h.bf16 %v1150_v54  ;;  %v1151_v59 = vunpack.i.l.bf16 %v1150_v54 }
  0x7f   :  { %1082 = vmatprep.subr.bf16.mxu0 %v1081_v55 }
  0x80   :  { %1084 = vmatpush3.bf16.msra.mxu0 %v1081_v55  ;;  %v53_v60 = vsel %vm50_vm1, %v32_v16, %v1151_v59  ;;  %v54_v61 = vsel %vm50_vm1, %v33_v20, %v1152_v58  ;;  %v252_v62 = vsel %vm251_vm2, %v1156_v50, %v1161_v57  ;;  %v253_v63 = vsel %vm251_vm2, %v1157_v49, %v1162_v56  ;;  %v1465_v49 = vld [vmem:[%s1535_s3 + $0x10] sm:$0xff]  ;;  %s1230_s3 = smov [#allocation2]  }
  0x81   :  { %v1085_v2 = vpack.c.bf16 %v54_v61, %v53_v60  ;;  %v1170_v3 = vpop.permute.xlu1 %1169  ;;  %v1165_v4 = vpop.permute.xlu0 %1164  ;;  %v1089_v13 = vpack.c.bf16 %v253_v63, %v252_v62  ;;  %s892_s15 = sshll.u32 %s1230_s3, 4  ;;  %s893_s15 = int_to_ptr.vmem [resolvable:$true] %s892_s15 }
  0x82   :  { %v1172_v5 = vunpack.i.h.bf16 %v1170_v3  ;;  %v1171_v6 = vunpack.i.l.bf16 %v1170_v3  ;;  %v1167_v8 = vunpack.i.h.bf16 %v1165_v4  ;;  %v1166_v10 = vunpack.i.l.bf16 %v1165_v4  ;;  %s1203_s16 = scalar_lea.vmem %s893_s15, 1024  ;;  %p1208_p1 = scmp.lt.s32.totalorder %s893_s15, %s893_s15 }
  0x83   :  { %1086 = vmatprep.subr.bf16.mxu0 %v1085_v2  ;;  %p1204_p0 = scmp.ne.s32.totalorder %s893_s15, %s1203_s16  ;;  %p1209_p2 = scmp.lt.s32.totalorder %s1203_s16, %s1203_s16 }
  0x84   :  { %1088 = vmatpush3.bf16.msra.mxu0 %v1085_v2  ;;  %v254_v12 = vsel %vm251_vm2, %v1166_v10, %v1171_v6  ;;  %v255_v14 = vsel %vm251_vm2, %v1167_v8, %v1172_v5 }
  0x85   :  { %1090 = vmatprep.subr.bf16.mxu0 %v1089_v13  ;;  %v1093_v16 = vpack.c.bf16 %v255_v14, %v254_v12  ;;  %v1175_v36 = vpop.permute.xlu0 %1174  ;;  %v1180_v41 = vpop.permute.xlu1 %1179  ;;  %p1210_p3 = por %p1209_p2, %p1208_p1 }
  0x86   :  { %v1177_v46 = vunpack.i.h.bf16 %v1175_v36  ;;  %v1176_v47 = vunpack.i.l.bf16 %v1175_v36  ;;  %v1182_v53 = vunpack.i.h.bf16 %v1180_v41  ;;  %v1181_v54 = vunpack.i.l.bf16 %v1180_v41 }
  0x87   :  { %1007 = vmatmul.mubr.msk.f32.vlgmr.msra.gmra.mrb[0].mxu0 %vm60_vm0, %v1428_v11  ;;  %p1211_p4 = pnand %p1210_p3, %p1204_p0 }
  0x88   :  { %1092 = vmatpush3.bf16.msra.mxu0 %v1089_v13  ;;  %1017 = vmatprep.mubr.msk.f32.mxu0 %vm60_vm0, %v1435_v17  ;;  %v488_v28 = vsel %vm50_vm1, %v468_v35, %v1176_v47  ;;  %v489_v50 = vsel %vm50_vm1, %v469_v37, %v1177_v46  ;;  %v490_v55 = vsel %vm50_vm1, %v470_v42, %v1181_v54 }
  0x89   :  { %1094 = vmatprep.subr.bf16.mxu0 %v1093_v16  ;;  %v1190_v51 = vpop.permute.xlu1 %1189  ;;  %v1185_v52 = vpop.permute.xlu0 %1184  ;;  %v1109_v32 = vpack.c.bf16 %v489_v50, %v488_v28  ;;  %v491_v56 = vsel %vm50_vm1, %v471_v43, %v1182_v53 }
  0x8a   :  { %v1192_v33 = vunpack.i.h.bf16 %v1190_v51  ;;  %v1191_v34 = vunpack.i.l.bf16 %v1190_v51  ;;  %v1187_v35 = vunpack.i.h.bf16 %v1185_v52  ;;  %v1186_v37 = vunpack.i.l.bf16 %v1185_v52 }
  0x8b   :  { %v1113_v59 = vpack.c.bf16 %v491_v56, %v490_v55 }
  0x8c   :  { %1096 = vmatpush3.bf16.msra.mxu0 %v1093_v16  ;;  %v686_v60 = vsel %vm251_vm2, %v1186_v37, %v1191_v34  ;;  %v687_v38 = vsel %vm251_vm2, %v1187_v35, %v1192_v33 }
  0x8d   :  { %v1200_v57 = vpop.permute.xlu1 %1199  ;;  %v1195_v58 = vpop.permute.xlu0 %1194  ;;  %v1117_v43 = vpack.c.bf16 %v687_v38, %v686_v60 }
  0x8e   :  { %v1202_v61 = vunpack.i.h.bf16 %v1200_v57  ;;  %v1201_v42 = vunpack.i.l.bf16 %v1200_v57  ;;  %v1197_v62 = vunpack.i.h.bf16 %v1195_v58  ;;  %v1196_v39 = vunpack.i.l.bf16 %v1195_v58 }
  0x8f   :  { %1018 = vmatmul.mubr.msk.f32.vlgmr.msra.gmra.mrb[0].mxu0 %vm60_vm0, %v1444_v18 }
  0x90   :  { %1067 = vmatprep.mubr.msk.f32.mxu0 %vm348_vm3, %v344_v19  ;;  %v689_v63 = vsel %vm251_vm2, %v1197_v62, %v1202_v61 }
 0x162   :  { %v1019_v20 = vpop.f32.mrb[0].mxu0 }
 0x163   :  { %v343_v21 = vmax.f32 %v1019_v20, 0.0  ;;  %v331_v22 = vpop.f32.mrb[1].mxu0 }
 0x164   :  { %v342_v40 = vmax.f32 %v331_v22, 0.0 }
 0x166   :  { %v1097_v44 = vpack.c.bf16 %v343_v21, %v342_v40 }
 0x168   :  { %1098 = vmatprep.subr.bf16.mxu1 %v1097_v44 }
 0x169   :  { %1100 = vmatpush3.bf16.msra.mxu1 %v1097_v44 }
 0x16a   :  { %1102 = vmatprep.subr.bf16.mxu1 %v1101_v45 }
 0x16c   :  { %1025 = vmatmul.mubr.msk.f32.vlgmr.msra.gmra.mrb[0].mxu1 %vm348_vm3, %v1460_v48 }
 0x16d   :  { %1104 = vmatpush3.bf16.msra.mxu1 %v1101_v45  ;;  %1027 = vmatprep.mubr.msk.f32.mxu1 %vm348_vm3, %v1465_v49 }
 0x16e   :  { %1106 = vmatprep.subr.bf16.mxu1 %v1105_v27 }
 0x170   :  { %1028 = vmatmul.mubr.msk.f32.gmra.mrb[2].mxu1 %vm348_vm3, %v347_v31 }
 0x171   :  { %1108 = vmatpush3.bf16.msra.mxu1 %v1105_v27  ;;  %1038 = vmatprep.mubr.msk.f32.mxu1 %vm60_vm0, %v1307_v15  ;;  %v688_v15 = vsel %vm251_vm2, %v1196_v39, %v1201_v42 }
 0x172   :  { %1110 = vmatprep.subr.bf16.mxu1 %v1109_v32  ;;  %v1121_v2 = vpack.c.bf16 %v689_v63, %v688_v15 }
 0x174   :  { %1039 = vmatmul.mubr.msk.f32.vlgmr.msra.gmra.mrb[4].mxu1 %vm60_vm0, %v1328_v23 }
 0x175   :  { %1112 = vmatpush3.bf16.msra.mxu1 %v1109_v32  ;;  %1049 = vmatprep.mubr.msk.f32.mxu1 %vm60_vm0, %v1333_v24 }
 0x176   :  { %1114 = vmatprep.subr.bf16.mxu1 %v1113_v59 }
 0x179   :  { %1116 = vmatpush3.bf16.msra.mxu1 %v1113_v59 }
 0x17a   :  { %1118 = vmatprep.subr.bf16.mxu1 %v1117_v43 }
 0x17c   :  { %1050 = vmatmul.mubr.msk.f32.vlgmr.msra.gmra.mrb[4].mxu1 %vm60_vm0, %v1428_v11 }
 0x17d   :  { %1120 = vmatpush3.bf16.msra.mxu1 %v1117_v43  ;;  %1060 = vmatprep.mubr.msk.f32.mxu1 %vm60_vm0, %v1435_v17 }
 0x17e   :  { %1122 = vmatprep.subr.bf16.mxu1 %v1121_v2 }
 0x181   :  { %1124 = vmatpush3.bf16.msra.mxu1 %v1121_v2 }
 0x184   :  { %1061 = vmatmul.mubr.msk.f32.vlgmr.msra.gmra.mrb[4].mxu1 %vm60_vm0, %v1444_v18 }
 0x23f   :  { %v1026_v23 = vpop.f32.mrb[0].mxu1 }
 0x240   :  { %v447_v24 = vadd.f32 %v1026_v23, %v1266_v1  ;;  %v427_v3 = vpop.f32.mrb[1].mxu1 }
 0x241   :  { %v446_v4 = vadd.f32 %v427_v3, %v1261_v0 }
 0x242   :  { %451 = vst [vmem:[#allocation2 + $0x8] sm:$0xff] %v447_v24 }
 0x243   :  { %450 = vst [vmem:[#allocation2] sm:$0xff] %v446_v4  ;;  %v1029_v5 = vpop.f32.mrb[2].mxu1 }
 0x244   :  { %v449_v6 = vadd.f32 %v1029_v5, %v1290_v9  ;;  %v437_v8 = vpop.f32.mrb[3].mxu1 }
 0x245   :  { %v448_v10 = vadd.f32 %v437_v8, %v1284_v7 }
 0x246   :  { %453 = vst [vmem:[#allocation2 + $0x18] sm:$0xff] %v449_v6 }
 0x247   :  { %452 = vst [vmem:[#allocation2 + $0x10] sm:$0xff] %v448_v10 }
 0x257   :  { %v1062_v13 = vpop.f32.mrb[4].mxu1 }
 0x258   :  { %v776_v11 = vmax.f32 %v1062_v13, 0.0  ;;  %v764_v12 = vpop.f32.mrb[5].mxu1 }
 0x259   :  { %v775_v14 = vmax.f32 %v764_v12, 0.0 }
 0x25b   :  { %v1125_v16 = vpack.c.bf16 %v776_v11, %v775_v14 }
 0x25d   :  { %1126 = vmatprep.subr.bf16.mxu0 %v1125_v16 }
 0x25e   :  { %1128 = vmatpush3.bf16.msra.mxu0 %v1125_v16 }
 0x261   :  { %1068 = vmatmul.mubr.msk.f32.vlgmr.msra.gmra.mrb[2].mxu0 %vm348_vm3, %v1460_v48 }
 0x262   :  { %1070 = vmatprep.mubr.msk.f32.mxu0 %vm348_vm3, %v1465_v49 }
 0x265   :  { %1071 = vmatmul.mubr.msk.f32.gmra.mrb[4].mxu0 %vm348_vm3, %v347_v31 }
 0x334   :  { %v1069_v0 = vpop.f32.mrb[2].mxu0 }
 0x335   :  { %v879_v1 = vadd.f32 %v1069_v0, %v1345_v26  ;;  %v859_v7 = vpop.f32.mrb[3].mxu0 }
 0x336   :  { %v878_v9 = vadd.f32 %v1340_v25, %v859_v7 }
 0x337   :  { %884 = vst [vmem:[#allocation2 + $0x28] sm:$0xff] %v879_v1 }
 0x338   :  { %883 = vst [vmem:[#allocation2 + $0x20] sm:$0xff] %v878_v9  ;;  %v1072_v17 = vpop.f32.mrb[4].mxu0 }
 0x339   :  { %v881_v18 = vadd.f32 %v1072_v17, %v1359_v30  ;;  %v869_v19 = vpop.f32.mrb[5].mxu0 }
 0x33a   :  { %v880_v20 = vadd.f32 %v1354_v29, %v869_v19 }
 0x33b   :  { %886 = vst [vmem:[#allocation2 + $0x38] sm:$0xff] %v881_v18 }
 0x33c   :  { %885 = vst [vmem:[#allocation2 + $0x30] sm:$0xff] %v880_v20 }
 0x33d   :  { %1214 = shalt.err (!%p1211_p4)
}
 0x33e   :  { %s1215_s19 = scalar_lea.hbm %s1536_s4, 1024 }
 0x33f   :  { %p1216_p5 = scmp.ne.s32.totalorder %s1536_s4, %s1215_s19  ;;  %p1219_p6 = scmp.lt.u32.totalorder %s1215_s19, %s1536_s4 }
 0x341   :  { %p1221_p7 = pnand %p1219_p6, %p1216_p5 }
 0x343   :  { %1224 = shalt.err (!%p1221_p7)
}
 0x344   :  { %s1231_s24 = smov 128   ;;  %s1232_s25 = smov 8  }
 0x345   :  { %898 = dma.vmem_to_hbm [thread:$0]  %s893_s15, 1024, %s1536_s4, [#allocation3], %s1231_s24, %s1231_s24, %s1232_s25  }
 0x346   :  { %1225 = dma.done.wait [#allocation3], 1024  }
 0x347   :  { %1226 = vsyncadd [#allocation3], 4294966272 }
 0x348   :  { %902 = vsyncpa [#allocation3], 1 }

</bundles_post_ra>
